<compile_context>
chip_gen: v5e
topology: v5e:2x2
jax: 0.10.0
libtpu: 0.0.40
codegen_flags: <defaults>
</compile_context>

<pallas_src>
import jax
import jax.numpy as jnp
from jax import lax
from jax.experimental import pallas as pl
from jax.experimental.pallas import tpu as pltpu


def _gelu_exact(x):
    # nn.GELU() default in PyTorch is the exact (erf-based) GELU.
    return 0.5 * x * (1.0 + lax.erf(x * (1.0 / jnp.sqrt(2.0).astype(x.dtype))))


def _round_up(n, m):
    return ((n + m - 1) // m) * m


def kae_kernel(x_ref, pw_ref, pb_ref, w1_ref, b1_ref, w2_ref, b2_ref,
               out_ref, acc_ref):
    k = pl.program_id(1)

    @pl.when(k == 0)
    def _():
        acc_ref[...] = jnp.zeros_like(acc_ref)

    tb, g = x_ref.shape           # batch-tile rows, input columns in this chunk
    hp = w1_ref.shape[1]          # padded hidden width (multiple of 128)

    # Build the slab on-chip: column (j*Hp + h) carries x[:, j] of this chunk.
    # Static lane slice -> lane broadcast -> 128-aligned concat (no MXU, no E).
    xv = x_ref[...]
    pieces = [jnp.broadcast_to(xv[:, j:j + 1], (tb, hp)) for j in range(g)]
    x_slab = pieces[0] if g == 1 else jnp.concatenate(pieces, axis=1)   # [TB, Kc]

    phi = _gelu_exact(x_slab * pw_ref[...] + pb_ref[...])               # [TB, Kc] f32
    acc_ref[...] += jnp.dot(phi.astype(w1_ref.dtype), w1_ref[...],
                            preferred_element_type=jnp.float32)

    @pl.when(k == pl.num_programs(1) - 1)
    def _():
        h1 = _gelu_exact(acc_ref[...] + b1_ref[...])                    # [TB, Hp] f32
        out = jnp.dot(h1.astype(w2_ref.dtype), w2_ref[...],
                      preferred_element_type=jnp.float32) + b2_ref[...]
        out_ref[...] = out.astype(out_ref.dtype)


def kolmogorov_arnold_expert(x, params, *, mxu_dtype=jnp.bfloat16):
    """x: [B, input_dim] float32. params: dict of stacked weights. Returns [B, output_dim]."""
    phi_w, phi_b = params["phi_w"], params["phi_b"]          # [I, H], [I, H]
    w1, b1 = params["w1"], params["b1"]                      # [I*H, H], [1, H]
    w2, b2 = params["w2"], params["b2"]                      # [H, O], [1, O]

    B, I = x.shape
    H = phi_w.shape[1]
    O = w2.shape[1]

    Hp = _round_up(H, 128)                 # lane-dense hidden dim
    Op = _round_up(O, 128)                 # lane-dense output dim
    K = I * Hp                             # contraction dim of fused phi @ w1
    mxu_bytes = jnp.dtype(mxu_dtype).itemsize

    # --- batch tile: minimize pad overshoot, prefer large lane-dense tiles ---
    if B <= 128:
        TILE_B = _round_up(max(B, 8), 8)
    else:
        best = None
        for t in (128, 256, 512):
            pad = _round_up(B, t)
            if best is None or pad < best[0] or (pad == best[0] and t > best[1]):
                best = (pad, t)
        TILE_B = best[1]
    B_pad = _round_up(B, TILE_B)
    nb = B_pad // TILE_B

    # --- per-chip VMEM budget (leave headroom; caps ~48 MiB on 64-MiB v7x) ---
    try:
        vmem_cap = int(pltpu.get_tpu_info().vmem_capacity_bytes)
    except Exception:
        vmem_cap = 64 << 20                 # conservative fallback
    vmem_budget = min(vmem_cap - (16 << 20), int(vmem_cap * 0.75))

    # --- K chunking: prefer w1 fully resident (nk == 1); otherwise equal
    #     Hp-multiple chunks with K zero-padded up to nk*Kc ---
    fixed_bytes = (2 * Hp * 4                      # b1 (double-buffered)
                   + 2 * Hp * Op * mxu_bytes       # w2
                   + 2 * Op * 4                    # b2
                   + 2 * TILE_B * Op * 4           # out tile
                   + TILE_B * Hp * 4)              # f32 accumulator scratch
    per_k = (2 * Hp * mxu_bytes                    # w1 rows (double-buffered)
             + 2 * 4 * 2                           # pw + pb rows
             + (2 * TILE_B * 4 + Hp - 1) // Hp     # x chunk rows
             + TILE_B * (4 + 4 + mxu_bytes))       # slab / phi / phi-cast temporaries
    avail = max(vmem_budget - fixed_bytes - (6 << 20), Hp * per_k)
    Kc_max = max(Hp, (avail // per_k) // Hp * Hp)

    if K <= Kc_max:
        nk, Kc = 1, K
    else:
        nk = -(-K // Kc_max)
        Kc = _round_up(-(-K // nk), Hp)
        nk = -(-K // Kc)
    K_pad = nk * Kc
    g = Kc // Hp
    I_pad = K_pad // Hp

    f32 = jnp.float32
    # --- zero-pad / repack operands (sliced/cropped outside the kernel) ---
    x_p = jnp.zeros((B_pad, I_pad), f32).at[:B, :I].set(x.astype(f32))
    x3 = x_p.reshape(B_pad, nk, g).transpose(1, 0, 2)                   # [nk, B_pad, g]
    pw_flat = jnp.zeros((I_pad, Hp), f32).at[:I, :H].set(phi_w).reshape(1, K_pad)
    pb_flat = jnp.zeros((I_pad, Hp), f32).at[:I, :H].set(phi_b).reshape(1, K_pad)
    w1_p = (jnp.zeros((I_pad, Hp, Hp), f32)
            .at[:I, :H, :H].set(w1.reshape(I, H, H))
            .reshape(K_pad, Hp).astype(mxu_dtype))
    b1_p = jnp.zeros((1, Hp), f32).at[:, :H].set(b1)
    w2_p = jnp.zeros((Hp, Op), f32).at[:H, :O].set(w2).astype(mxu_dtype)
    b2_p = jnp.zeros((1, Op), f32).at[:, :O].set(b2)

    grid = (nb, nk)
    in_specs = [
        pl.BlockSpec((None, TILE_B, g), lambda b, k: (k, b, 0)),   # x chunk (per k)
        pl.BlockSpec((1, Kc), lambda b, k: (0, k)),                # phi_w chunk
        pl.BlockSpec((1, Kc), lambda b, k: (0, k)),                # phi_b chunk
        pl.BlockSpec((Kc, Hp), lambda b, k: (k, 0)),               # w1 chunk (resident if nk==1)
        pl.BlockSpec((1, Hp), lambda b, k: (0, 0)),                # b1 (resident)
        pl.BlockSpec((Hp, Op), lambda b, k: (0, 0)),               # w2 (resident)
        pl.BlockSpec((1, Op), lambda b, k: (0, 0)),                # b2 (resident)
    ]
    out_spec = pl.BlockSpec((TILE_B, Op), lambda b, k: (b, 0))

    vmem_limit = int(min(vmem_budget,
                         max(32 << 20, fixed_bytes + Kc * per_k + (8 << 20))))

    # w1/pw/pb get re-DMA'd per batch tile only when their block index changes (nk > 1).
    w1_fetches = nb if nk > 1 else 1
    cost = pl.CostEstimate(
        flops=int(2 * B_pad * (K_pad * Hp + Hp * Op)),
        transcendentals=int(B_pad * (K_pad + Hp)),
        bytes_accessed=int(4 * B_pad * I_pad
                           + w1_fetches * (mxu_bytes * K_pad * Hp + 2 * 4 * K_pad)
                           + mxu_bytes * Hp * Op + 4 * (Hp + Op)
                           + 4 * B_pad * Op),
    )

    out_p = pl.pallas_call(
        kae_kernel,
        out_shape=jax.ShapeDtypeStruct((B_pad, Op), x.dtype),
        grid=grid,
        in_specs=in_specs,
        out_specs=out_spec,
        scratch_shapes=[pltpu.VMEM((TILE_B, Hp), jnp.float32)],
        compiler_params=pltpu.CompilerParams(
            dimension_semantics=("parallel", "arbitrary"),
            vmem_limit_bytes=vmem_limit,
        ),
        cost_estimate=cost,
    )(x3, pw_flat, pb_flat, w1_p, b1_p, w2_p, b2_p)

    return out_p[:B, :O]


def init_params(key, input_dim, hidden_dim, output_dim, dtype=jnp.float32):
    """Deterministic xavier_uniform weights, zero biases (matches initialize_weights)."""
    k1, k2, k3 = jax.random.split(key, 3)

    def xavier(k, fan_in, fan_out, shape):
        bound = jnp.sqrt(6.0 / (fan_in + fan_out))
        return jax.random.uniform(k, shape, dtype, -bound, bound)

    # phi_i: Linear(1, hidden_dim) -> weight [H, 1]; stacked & squeezed to [I, H]
    phi_w = xavier(k1, 1, hidden_dim, (input_dim, hidden_dim))
    phi_b = jnp.zeros((input_dim, hidden_dim), dtype)
    # psi: Linear(I*H, H) then Linear(H, O); stored pre-transposed for y = x @ W
    w1 = xavier(k2, input_dim * hidden_dim, hidden_dim, (input_dim * hidden_dim, hidden_dim))
    b1 = jnp.zeros((1, hidden_dim), dtype)
    w2 = xavier(k3, hidden_dim, output_dim, (hidden_dim, output_dim))
    b2 = jnp.zeros((1, output_dim), dtype)
    return dict(phi_w=phi_w, phi_b=phi_b, w1=w1, b1=b1, w2=w2, b2=b2)


def reference_forward(x, params):
    """Plain-JAX f32 reference matching the PyTorch forward."""
    phi = _gelu_exact(x[:, :, None] * params["phi_w"][None] + params["phi_b"][None])  # [B,I,H]
    concat = phi.reshape(x.shape[0], -1)                                              # [B,I*H]
    h1 = _gelu_exact(concat @ params["w1"] + params["b1"])
    return h1 @ params["w2"] + params["b2"]


if __name__ == "__main__":
    B, INPUT_DIM, HIDDEN_DIM, OUTPUT_DIM = 2, 4, 32, 8

    key = jax.random.PRNGKey(0)
    kx, kp = jax.random.split(key)
    x = jax.random.normal(kx, (B, INPUT_DIM), jnp.float32)
    params = init_params(kp, INPUT_DIM, HIDDEN_DIM, OUTPUT_DIM)

    out = kolmogorov_arnold_expert(x, params)
    out = jax.block_until_ready(out)

    ref = reference_forward(x, params)
    assert out.shape == (B, OUTPUT_DIM)
    # bf16 MXU operands (f32 accumulation) deviate slightly from the f32 reference.
    assert jnp.allclose(out, ref, atol=2e-2, rtol=2e-2), "Pallas output mismatch vs reference"

    print("KERNEL_OK")
</pallas_src>

<mosaic_0001>
module attributes {stable_mosaic.version = 11 : i64} {
  func.func @kae_kernel(%arg0: i32, %arg1: i32, %arg2: memref<1x8x4xf32, #tpu.memory_space<vmem>>, %arg3: memref<1x512xf32, #tpu.memory_space<vmem>>, %arg4: memref<1x512xf32, #tpu.memory_space<vmem>>, %arg5: memref<512x128xbf16, #tpu.memory_space<vmem>>, %arg6: memref<1x128xf32, #tpu.memory_space<vmem>>, %arg7: memref<128x128xbf16, #tpu.memory_space<vmem>>, %arg8: memref<1x128xf32, #tpu.memory_space<vmem>>, %arg9: memref<8x128xf32, #tpu.memory_space<vmem>>, %arg10: memref<8x128xf32, #tpu.memory_space<vmem>>) attributes {dimension_semantics = [#tpu.dimension_semantics<parallel>, #tpu.dimension_semantics<arbitrary>], iteration_bounds = array<i64: 1, 1>, scalar_prefetch = 0 : i64, scratch_operands = 1 : i64, tpu.core_type = #tpu.core_type<tc>, window_params = [{transform_indices = @transform_0, window_bounds = array<i64: 1, 8, 4>}, {transform_indices = @transform_1, window_bounds = array<i64: 1, 512>}, {transform_indices = @transform_2, window_bounds = array<i64: 1, 512>}, {transform_indices = @transform_3, window_bounds = array<i64: 512, 128>}, {pipeline_mode = #tpu.pipeline_mode<synchronous>, transform_indices = @transform_4, window_bounds = array<i64: 1, 128>}, {pipeline_mode = #tpu.pipeline_mode<synchronous>, transform_indices = @transform_5, window_bounds = array<i64: 128, 128>}, {pipeline_mode = #tpu.pipeline_mode<synchronous>, transform_indices = @transform_6, window_bounds = array<i64: 1, 128>}, {transform_indices = @transform_7, window_bounds = array<i64: 8, 128>}]} {
    %c0_i32 = arith.constant 0 : i32
    %0 = arith.cmpi eq, %arg1, %c0_i32 : i32
    %1 = arith.extui %0 : i1 to i32
    %c0_i32_0 = arith.constant 0 : i32
    %2 = arith.cmpi ne, %1, %c0_i32_0 : i32
    scf.if %2 {
      %cst_19 = arith.constant 0.000000e+00 : f32
      %43 = vector.broadcast %cst_19 : f32 to vector<8x128xf32>
      %c0_20 = arith.constant 0 : index
      %c0_21 = arith.constant 0 : index
      %44 = vector.load %arg10[%c0_20, %c0_21] : memref<8x128xf32, #tpu.memory_space<vmem>>, vector<8x128xf32>
      tpu.vector_store %arg10[%c0_20, %c0_21], %43 {strides = array<i32>} : memref<8x128xf32, #tpu.memory_space<vmem>>, vector<8x128xf32>,
    } else {
    }
    %c0 = arith.constant 0 : index
    %c0_1 = arith.constant 0 : index
    %c0_2 = arith.constant 0 : index
    %3 = vector.load %arg2[%c0, %c0_1, %c0_2] : memref<1x8x4xf32, #tpu.memory_space<vmem>>, vector<1x8x4xf32>
    %4 = vector.shape_cast %3 : vector<1x8x4xf32> to vector<8x4xf32>
    %5 = vector.extract_strided_slice %4 {offsets = [0, 0], sizes = [8, 1], strides = [1, 1]} : vector<8x4xf32> to vector<8x1xf32>
    %6 = vector.shape_cast %5 : vector<8x1xf32> to vector<8x1xf32>
    %7 = vector.broadcast %6 : vector<8x1xf32> to vector<8x128xf32>
    %8 = vector.extract_strided_slice %4 {offsets = [0, 1], sizes = [8, 1], strides = [1, 1]} : vector<8x4xf32> to vector<8x1xf32>
    %9 = vector.shape_cast %8 : vector<8x1xf32> to vector<8x1xf32>
    %10 = vector.broadcast %9 : vector<8x1xf32> to vector<8x128xf32>
    %11 = vector.extract_strided_slice %4 {offsets = [0, 2], sizes = [8, 1], strides = [1, 1]} : vector<8x4xf32> to vector<8x1xf32>
    %12 = vector.shape_cast %11 : vector<8x1xf32> to vector<8x1xf32>
    %13 = vector.broadcast %12 : vector<8x1xf32> to vector<8x128xf32>
    %14 = vector.extract_strided_slice %4 {offsets = [0, 3], sizes = [8, 1], strides = [1, 1]} : vector<8x4xf32> to vector<8x1xf32>
    %15 = vector.shape_cast %14 : vector<8x1xf32> to vector<8x1xf32>
    %16 = vector.broadcast %15 : vector<8x1xf32> to vector<8x128xf32>
    %17 = tpu.concatenate %7, %10, %13, %16 in 1 : vector<8x128xf32>, vector<8x128xf32>, vector<8x128xf32>, vector<8x128xf32> -> vector<8x512xf32>
    %c0_3 = arith.constant 0 : index
    %c0_4 = arith.constant 0 : index
    %18 = vector.load %arg3[%c0_3, %c0_4] : memref<1x512xf32, #tpu.memory_space<vmem>>, vector<1x512xf32>
    %19 = vector.broadcast %18 : vector<1x512xf32> to vector<8x512xf32>
    %20 = arith.mulf %17, %19 : vector<8x512xf32>
    %c0_5 = arith.constant 0 : index
    %c0_6 = arith.constant 0 : index
    %21 = vector.load %arg4[%c0_5, %c0_6] : memref<1x512xf32, #tpu.memory_space<vmem>>, vector<1x512xf32>
    %22 = vector.broadcast %21 : vector<1x512xf32> to vector<8x512xf32>
    %23 = arith.addf %20, %22 : vector<8x512xf32>
    %cst = arith.constant 5.000000e-01 : f32
    %24 = vector.broadcast %cst : f32 to vector<8x512xf32>
    %25 = arith.mulf %24, %23 : vector<8x512xf32>
    %cst_7 = arith.constant 2.000000e+00 : f32
    %26 = math.sqrt %cst_7 : f32
    %cst_8 = arith.constant 1.000000e+00 : f32
    %27 = arith.divf %cst_8, %26 : f32
    %28 = vector.broadcast %27 : f32 to vector<8x512xf32>
    %29 = arith.mulf %23, %28 : vector<8x512xf32>
    %30 = math.erf %29 : vector<8x512xf32>
    %cst_9 = arith.constant 1.000000e+00 : f32
    %31 = vector.broadcast %cst_9 : f32 to vector<8x512xf32>
    %32 = arith.addf %31, %30 : vector<8x512xf32>
    %33 = arith.mulf %25, %32 : vector<8x512xf32>
    %c0_10 = arith.constant 0 : index
    %c0_11 = arith.constant 0 : index
    %34 = vector.load %arg10[%c0_10, %c0_11] : memref<8x128xf32, #tpu.memory_space<vmem>>, vector<8x128xf32>
    %35 = arith.truncf %33 : vector<8x512xf32> to vector<8x512xbf16>
    %c0_12 = arith.constant 0 : index
    %c0_13 = arith.constant 0 : index
    %36 = vector.load %arg5[%c0_12, %c0_13] : memref<512x128xbf16, #tpu.memory_space<vmem>>, vector<512x128xbf16>
    %cst_14 = arith.constant dense<0.000000e+00> : vector<8x128xf32>
    %37 = tpu.matmul %35, %36, %cst_14 {dimension_numbers = #tpu.dot_dimension_numbers<[1], [0], [0], [1], [0, 0, 1, 1], [], []>} : vector<8x512xbf16>, vector<512x128xbf16>, vector<8x128xf32> -> vector<8x128xf32>
    %38 = arith.addf %34, %37 : vector<8x128xf32>
    %c0_15 = arith.constant 0 : index
    %c0_16 = arith.constant 0 : index
    %39 = vector.load %arg10[%c0_15, %c0_16] : memref<8x128xf32, #tpu.memory_space<vmem>>, vector<8x128xf32>
    tpu.vector_store %arg10[%c0_15, %c0_16], %38 {strides = array<i32>} : memref<8x128xf32, #tpu.memory_space<vmem>>, vector<8x128xf32>,
    %c0_i32_17 = arith.constant 0 : i32
    %40 = arith.cmpi eq, %arg1, %c0_i32_17 : i32
    %41 = arith.extui %40 : i1 to i32
    %c0_i32_18 = arith.constant 0 : i32
    %42 = arith.cmpi ne, %41, %c0_i32_18 : i32
    scf.if %42 {
      %c0_19 = arith.constant 0 : index
      %c0_20 = arith.constant 0 : index
      %43 = vector.load %arg10[%c0_19, %c0_20] : memref<8x128xf32, #tpu.memory_space<vmem>>, vector<8x128xf32>
      %c0_21 = arith.constant 0 : index
      %c0_22 = arith.constant 0 : index
      %44 = vector.load %arg6[%c0_21, %c0_22] : memref<1x128xf32, #tpu.memory_space<vmem>>, vector<1x128xf32>
      %45 = vector.broadcast %44 : vector<1x128xf32> to vector<8x128xf32>
      %46 = arith.addf %43, %45 : vector<8x128xf32>
      %cst_23 = arith.constant 5.000000e-01 : f32
      %47 = vector.broadcast %cst_23 : f32 to vector<8x128xf32>
      %48 = arith.mulf %47, %46 : vector<8x128xf32>
      %cst_24 = arith.constant 2.000000e+00 : f32
      %49 = math.sqrt %cst_24 : f32
      %cst_25 = arith.constant 1.000000e+00 : f32
      %50 = arith.divf %cst_25, %49 : f32
      %51 = vector.broadcast %50 : f32 to vector<8x128xf32>
      %52 = arith.mulf %46, %51 : vector<8x128xf32>
      %53 = math.erf %52 : vector<8x128xf32>
      %cst_26 = arith.constant 1.000000e+00 : f32
      %54 = vector.broadcast %cst_26 : f32 to vector<8x128xf32>
      %55 = arith.addf %54, %53 : vector<8x128xf32>
      %56 = arith.mulf %48, %55 : vector<8x128xf32>
      %57 = arith.truncf %56 : vector<8x128xf32> to vector<8x128xbf16>
      %c0_27 = arith.constant 0 : index
      %c0_28 = arith.constant 0 : index
      %58 = vector.load %arg7[%c0_27, %c0_28] : memref<128x128xbf16, #tpu.memory_space<vmem>>, vector<128x128xbf16>
      %cst_29 = arith.constant dense<0.000000e+00> : vector<8x128xf32>
      %59 = tpu.matmul %57, %58, %cst_29 {dimension_numbers = #tpu.dot_dimension_numbers<[1], [0], [0], [1], [0, 0, 1, 1], [], []>} : vector<8x128xbf16>, vector<128x128xbf16>, vector<8x128xf32> -> vector<8x128xf32>
      %c0_30 = arith.constant 0 : index
      %c0_31 = arith.constant 0 : index
      %60 = vector.load %arg8[%c0_30, %c0_31] : memref<1x128xf32, #tpu.memory_space<vmem>>, vector<1x128xf32>
      %61 = vector.broadcast %60 : vector<1x128xf32> to vector<8x128xf32>
      %62 = arith.addf %59, %61 : vector<8x128xf32>
      %c0_32 = arith.constant 0 : index
      %c0_33 = arith.constant 0 : index
      %63 = vector.load %arg9[%c0_32, %c0_33] : memref<8x128xf32, #tpu.memory_space<vmem>>, vector<8x128xf32>
      tpu.vector_store %arg9[%c0_32, %c0_33], %62 {strides = array<i32>} : memref<8x128xf32, #tpu.memory_space<vmem>>, vector<8x128xf32>,
    } else {
    }
    return
  }
  func.func @transform_0(%arg0: i32, %arg1: i32) -> (i32, i32, i32) {
    %c0_i32 = arith.constant 0 : i32
    %c0_i32_0 = arith.constant 0 : i32
    return %arg1, %arg0, %c0_i32 : i32, i32, i32
  }
  func.func @transform_1(%arg0: i32, %arg1: i32) -> (i32, i32) {
    %c0_i32 = arith.constant 0 : i32
    %c0_i32_0 = arith.constant 0 : i32
    return %c0_i32, %arg1 : i32, i32
  }
  func.func @transform_2(%arg0: i32, %arg1: i32) -> (i32, i32) {
    %c0_i32 = arith.constant 0 : i32
    %c0_i32_0 = arith.constant 0 : i32
    return %c0_i32, %arg1 : i32, i32
  }
  func.func @transform_3(%arg0: i32, %arg1: i32) -> (i32, i32) {
    %c0_i32 = arith.constant 0 : i32
    %c0_i32_0 = arith.constant 0 : i32
    return %arg1, %c0_i32 : i32, i32
  }
  func.func @transform_4(%arg0: i32, %arg1: i32) -> (i32, i32) {
    %c0_i32 = arith.constant 0 : i32
    %c0_i32_0 = arith.constant 0 : i32
    %c0_i32_1 = arith.constant 0 : i32
    return %c0_i32, %c0_i32_0 : i32, i32
  }
  func.func @transform_5(%arg0: i32, %arg1: i32) -> (i32, i32) {
    %c0_i32 = arith.constant 0 : i32
    %c0_i32_0 = arith.constant 0 : i32
    %c0_i32_1 = arith.constant 0 : i32
    return %c0_i32, %c0_i32_0 : i32, i32
  }
  func.func @transform_6(%arg0: i32, %arg1: i32) -> (i32, i32) {
    %c0_i32 = arith.constant 0 : i32
    %c0_i32_0 = arith.constant 0 : i32
    %c0_i32_1 = arith.constant 0 : i32
    return %c0_i32, %c0_i32_0 : i32, i32
  }
  func.func @transform_7(%arg0: i32, %arg1: i32) -> (i32, i32) {
    %c0_i32 = arith.constant 0 : i32
    %c0_i32_0 = arith.constant 0 : i32
    return %arg0, %c0_i32 : i32, i32
  }
}

</mosaic_0001>

<bundles_post_ra>
// kernel: tpu_custom_call.1
= control target key start
LH: loop header
LB: loop body
LE: loop exit
PB: predicated region body
PF: predicated region fallthrough
CT: control target
= control target key end

     0   :  { %12 = vsyncpa [#allocation4], 0  ;;  %s1235_s0 = inlined_call_operand.vmem [shape: f32[1,8,4], index: 0, kind: input, shape index: {}]   ;;  %s1236_s1 = inlined_call_operand.vmem [shape: f32[1,512], index: 1, kind: input, shape index: {}]   ;;  %s1237_s2 = inlined_call_operand.vmem [shape: f32[1,512], index: 2, kind: input, shape index: {}]   ;;  %s1238_s3 = inlined_call_operand.hbm [shape: bf16[512,128], index: 3, kind: input, shape index: {}]   ;;  %s1239_s4 = inlined_call_operand.vmem [shape: f32[1,128], index: 4, kind: input, shape index: {}]   ;;  %s1240_s5 = inlined_call_operand.hbm [shape: bf16[128,128], index: 5, kind: input, shape index: {}]   ;;  %s1241_s6 = inlined_call_operand.vmem [shape: f32[1,128], index: 6, kind: input, shape index: {}]   ;;  %s1242_s7 = inlined_call_operand.hbm [shape: f32[8,128], index: 7, kind: output, shape index: {}]  }
   0x1   :  { %13 = vsyncpa [#allocation7], 0 }
   0x2   :  { %14 = vsyncpa [#allocation5], 0  ;;  %s25_s26 = sshll.u32 %s1238_s3, 4  ;;  %s1063_s27 = smov [#allocation3]   ;;  %s26_s26 = int_to_ptr.hbm [resolvable:$true] %s25_s26 }
   0x3   :  { %s27_s28 = sshll.u32 %s1063_s27, 4  ;;  %s40_s8 = sshll.u32 %s1240_s5, 4  ;;  %s28_s28 = int_to_ptr.vmem [resolvable:$true] %s27_s28  ;;  %s41_s8 = int_to_ptr.hbm [resolvable:$true] %s40_s8 }
   0x4   :  { %s1064_s9 = smov 64   ;;  %s1065_s10 = smov 4  }
   0x5   :  { %33 = dma.hbm_to_vmem [thread:$0]  %s26_s26, 4096, %s28_s28, [#allocation4], %s1064_s9, %s1064_s9, %s1065_s10  }
   0x6   :  { %s1066_s11 = smov [#allocation6]  }
   0x7   :  { %s42_s12 = sshll.u32 %s1066_s11, 4  ;;  %s43_s12 = int_to_ptr.vmem [resolvable:$true] %s42_s12 }
   0x8   :  { %48 = dma.hbm_to_vmem [thread:$0]  %s41_s8, 1024, %s43_s12, [#allocation7], %s1064_s9, %s1064_s9, %s1065_s10  }
   0x9   :  { %1057 = dma.done.wait [#allocation4], 4096  }
   0xa   :  { %1058 = vsyncadd [#allocation4], 4294963200 }
   0xb   :  { %1059 = dma.done.wait [#allocation7], 1024  }
   0xc   :  { %1060 = vsyncadd [#allocation7], 4294966272  ;;  %v1067_v0 = vmov 2   ;;  %v1068_v1 = vmov 0   ;;  %v64_v2 = vld [vmem:[%s1235_s0] sm:$0xff]  ;;  %v1069_v3 = vmov 1  }
   0xd   :  { %969 = vset.pattern.permute.xlu0 %v1067_v0  ;;  %971 = vset.pattern.permute.xlu1 %v1068_v1  ;;  %v1070_v4 = vmov 3   ;;  %v927_v5 = vld [vmem:[#allocation3 + $0x38] sm:$0xff]  ;;  %v82_v7 = vld [vmem:[%s1236_s1] sm:$0xf]  ;;  %v926_v11 = vld [vmem:[#allocation3 + $0x30] sm:$0xff]  ;;  %s1071_s17 = smov [#allocation8]  }
   0xe   :  { %67 = vperm.xlu1 %971, %v64_v2   ;;  %75 = vperm.xlu0 %969, %v64_v2   ;;  %v943_v6 = vld [vmem:[#allocation3 + $0xb8] sm:$0xff]  ;;  %v96_v8 = vld [vmem:[%s1237_s2] sm:$0xf]  ;;  %v84_v9 = vperm.slane %v82_v7, 0  ;;  %v86_v10 = vperm.slane %v82_v7, 2  ;;  %v942_v12 = vld [vmem:[#allocation3 + $0xb0] sm:$0xff] }
   0xf   :  { %547 = vmatpush.bf16.msra.mxu0 %v927_v5  ;;  %573 = vmatpush.bf16.msra.mxu2 %v943_v6  ;;  %v98_v13 = vperm.slane %v96_v8, 0  ;;  %v100_v14 = vperm.slane %v96_v8, 2  ;;  %v925_v19 = vld [vmem:[#allocation3 + $0x28] sm:$0xff]  ;;  %v935_v21 = vld [vmem:[#allocation3 + $0x78] sm:$0xff]  ;;  %v924_v27 = vld [vmem:[#allocation3 + $0x20] sm:$0xff]  ;;  %v85_v29 = vperm.slane %v82_v7, 1 }
  0x10   :  { %v941_v20 = vld [vmem:[#allocation3 + $0xa8] sm:$0xff]  ;;  %v951_v22 = vld [vmem:[#allocation3 + $0xf8] sm:$0xff]  ;;  %560 = vmatpush.bf16.msra.mxu1 %v935_v21  ;;  %v940_v28 = vld [vmem:[#allocation3 + $0xa0] sm:$0xff]  ;;  %v87_v30 = vperm.slane %v82_v7, 3  ;;  %v99_v35 = vperm.slane %v96_v8, 1  ;;  %v101_v36 = vperm.slane %v96_v8, 3 }
  0x11   :  { %586 = vmatpush.bf16.msra.mxu3 %v951_v22  ;;  %v934_v31 = vld [vmem:[#allocation3 + $0x70] sm:$0xff]  ;;  %v923_v37 = vld [vmem:[#allocation3 + $0x18] sm:$0xff]  ;;  %v933_v39 = vld [vmem:[#allocation3 + $0x68] sm:$0xff]  ;;  %s742_s18 = sshll.u32 %s1071_s17, 4  ;;  %s744_s21 = sshll.u32 %s1242_s7, 4  ;;  %s743_s18 = int_to_ptr.vmem [resolvable:$true] %s742_s18  ;;  %s745_s21 = int_to_ptr.hbm [resolvable:$true] %s744_s21 }
  0x12   :  { %v950_v32 = vld [vmem:[#allocation3 + $0xf0] sm:$0xff]  ;;  %v939_v38 = vld [vmem:[#allocation3 + $0x98] sm:$0xff]  ;;  %v949_v44 = vld [vmem:[#allocation3 + $0xe8] sm:$0xff] }
  0x13   :  { %548 = vmatpush.bf16.msra.mxu0 %v926_v11  ;;  %574 = vmatpush.bf16.msra.mxu2 %v942_v12  ;;  %v922_v49 = vld [vmem:[#allocation3 + $0x10] sm:$0xff]  ;;  %v932_v53 = vld [vmem:[#allocation3 + $0x60] sm:$0xff]  ;;  %v921_v63 = vld [vmem:[#allocation3 + $0x8] sm:$0xff] }
  0x14   :  { %561 = vmatpush.bf16.msra.mxu1 %v934_v31  ;;  %v938_v50 = vld [vmem:[#allocation3 + $0x90] sm:$0xff]  ;;  %v948_v54 = vld [vmem:[#allocation3 + $0xe0] sm:$0xff]  ;;  %v937_v0 = vld [vmem:[#allocation3 + $0x88] sm:$0xff] }
  0x15   :  { %587 = vmatpush.bf16.msra.mxu3 %v950_v32  ;;  %v947_v5 = vld [vmem:[#allocation3 + $0xd8] sm:$0xff]  ;;  %v920_v12 = vld [vmem:[#allocation3] sm:$0xff] }
  0x16   :  { %972 = vset.pattern.permute.xlu1 %v1069_v3  ;;  %970 = vset.pattern.permute.xlu0 %v1070_v4  ;;  %v931_v4 = vld [vmem:[#allocation3 + $0x58] sm:$0xff] }
  0x17   :  { %71 = vperm.xlu1 %972, %v64_v2   ;;  %79 = vperm.xlu0 %970, %v64_v2  }
  0x18   :  { %549 = vmatpush.bf16.msra.mxu0 %v925_v19  ;;  %575 = vmatpush.bf16.msra.mxu2 %v941_v20 }
  0x19   :  { %562 = vmatpush.bf16.msra.mxu1 %v933_v39  ;;  %588 = vmatpush.bf16.msra.mxu3 %v949_v44 }
  0x1c   :  { %550 = vmatpush.bf16.msra.mxu0 %v924_v27  ;;  %576 = vmatpush.bf16.msra.mxu2 %v940_v28 }
  0x1d   :  { %563 = vmatpush.bf16.msra.mxu1 %v932_v53  ;;  %589 = vmatpush.bf16.msra.mxu3 %v948_v54 }
  0x20   :  { %551 = vmatpush.bf16.msra.mxu0 %v923_v37  ;;  %577 = vmatpush.bf16.msra.mxu2 %v939_v38 }
  0x21   :  { %564 = vmatpush.bf16.msra.mxu1 %v931_v4  ;;  %590 = vmatpush.bf16.msra.mxu3 %v947_v5 }
  0x24   :  { %552 = vmatpush.bf16.msra.mxu0 %v922_v49  ;;  %578 = vmatpush.bf16.msra.mxu2 %v938_v50 }
  0x28   :  { %553 = vmatpush.bf16.msra.mxu0 %v921_v63  ;;  %579 = vmatpush.bf16.msra.mxu2 %v937_v0 }
  0x2c   :  { %554 = vmatpush.bf16.msra.mxu0 %v920_v12 }
  0x80   :  { %v68_v15 = vpop.permute.xlu1 %67  ;;  %v76_v16 = vpop.permute.xlu0 %75 }
  0x81   :  { %v92_v17 = vmul.f32 %v84_v9, %v68_v15  ;;  %v94_v18 = vmul.f32 %v86_v10, %v76_v16 }
  0x83   :  { %v1127_v23 = vadd.f32 %v98_v13, %v92_v17  ;;  %v1129_v24 = vadd.f32 %v100_v14, %v94_v18  ;;  %v936_v13 = vld [vmem:[#allocation3 + $0x80] sm:$0xff]  ;;  %v930_v14 = vld [vmem:[#allocation3 + $0x50] sm:$0xff] }
  0x84   :  { %v946_v18 = vld [vmem:[#allocation3 + $0xd0] sm:$0xff]  ;;  %580 = vmatpush.bf16.msra.mxu2 %v936_v13  ;;  %565 = vmatpush.bf16.msra.mxu1 %v930_v14 }
  0x85   :  { %v1132_v25 = vmul.f32 0.70710677, %v1127_v23  ;;  %v1135_v26 = vmul.f32 0.70710677, %v1129_v24  ;;  %591 = vmatpush.bf16.msra.mxu3 %v946_v18 }
  0x87   :  { %v118_v33 = vmul.f32 %v1132_v25, %v1132_v25  ;;  %v198_v34 = vmul.f32 %v1135_v26, %v1135_v26 }
  0x89   :  { %v1141_v40 = vmin.f32 %v118_v33, 16.0  ;;  %v1143_v41 = vmin.f32 %v198_v34, 16.0  ;;  %v72_v42 = vpop.permute.xlu1 %71  ;;  %v80_v43 = vpop.permute.xlu0 %79 }
  0x8a   :  { %v93_v45 = vmul.f32 %v85_v29, %v72_v42  ;;  %v95_v46 = vmul.f32 %v87_v30, %v80_v43 }
  0x8b   :  { %v120_v47 = vmul.f32 2.1237322e-06, %v1141_v40  ;;  %v200_v48 = vmul.f32 2.1237322e-06, %v1143_v41  ;;  %v131_v55 = vmul.f32 3.8918573e-05, %v1141_v40 }
  0x8c   :  { %v1147_v51 = vadd.f32 %v99_v35, %v93_v45  ;;  %v1149_v52 = vadd.f32 %v101_v36, %v95_v46  ;;  %v211_v1 = vmul.f32 3.8918573e-05, %v1143_v41 }
  0x8d   :  { %v121_v56 = vadd.f32 0.00028619796, %v120_v47  ;;  %v201_v57 = vadd.f32 0.00028619796, %v200_v48  ;;  %v132_v60 = vadd.f32 0.001143296, %v131_v55 }
  0x8e   :  { %v1153_v58 = vmul.f32 0.70710677, %v1147_v51  ;;  %v1156_v59 = vmul.f32 0.70710677, %v1149_v52  ;;  %v212_v8 = vadd.f32 0.001143296, %v211_v1 }
  0x8f   :  { %v122_v61 = vmul.f32 %v121_v56, %v1141_v40  ;;  %v202_v62 = vmul.f32 %v201_v57, %v1143_v41  ;;  %v133_v6 = vmul.f32 %v132_v60, %v1141_v40  ;;  %v929_v56 = vld [vmem:[#allocation3 + $0x48] sm:$0xff]  ;;  %v928_v1 = vld [vmem:[#allocation3 + $0x40] sm:$0xff] }
  0x90   :  { %v158_v2 = vmul.f32 %v1153_v58, %v1153_v58  ;;  %v238_v3 = vmul.f32 %v1156_v59, %v1156_v59  ;;  %v213_v15 = vmul.f32 %v212_v8, %v1143_v41  ;;  %566 = vmatpush.bf16.msra.mxu1 %v929_v56 }
  0x91   :  { %v123_v7 = vadd.f32 0.0036580483, %v122_v61  ;;  %v203_v9 = vadd.f32 0.0036580483, %v202_v62  ;;  %v134_v11 = vadd.f32 0.014752088, %v133_v6 }
  0x92   :  { %v1166_v10 = vmin.f32 %v158_v2, 16.0  ;;  %v1170_v17 = vmin.f32 %v238_v3, 16.0  ;;  %v214_v21 = vadd.f32 0.014752088, %v213_v15  ;;  %v945_v61 = vld [vmem:[#allocation3 + $0xc8] sm:$0xff]  ;;  %v944_v3 = vld [vmem:[#allocation3 + $0xc0] sm:$0xff] }
  0x93   :  { %v135_v19 = vmul.f32 %v134_v11, %v1141_v40  ;;  %v124_v22 = vmul.f32 %v123_v7, %v1141_v40  ;;  %v204_v27 = vmul.f32 %v203_v9, %v1143_v41  ;;  %592 = vmatpush.bf16.msra.mxu3 %v945_v61 }
  0x94   :  { %v160_v16 = vmul.f32 2.1237322e-06, %v1166_v10  ;;  %v171_v20 = vmul.f32 3.8918573e-05, %v1166_v10  ;;  %v215_v30 = vmul.f32 %v214_v21, %v1143_v41  ;;  %v240_v33 = vmul.f32 2.1237322e-06, %v1170_v17  ;;  %567 = vmatpush.bf16.msra.mxu1 %v928_v1 }
  0x95   :  { %v136_v29 = vadd.f32 0.112945676, %v135_v19  ;;  %v251_v35 = vmul.f32 3.8918573e-05, %v1170_v17  ;;  %v125_v38 = vadd.f32 0.05243302, %v124_v22 }
  0x96   :  { %v161_v28 = vadd.f32 0.00028619796, %v160_v16  ;;  %v172_v31 = vadd.f32 0.001143296, %v171_v20  ;;  %v216_v36 = vadd.f32 0.112945676, %v215_v30 }
  0x97   :  { %v137_v34 = vmul.f32 %v136_v29, %v1141_v40  ;;  %v205_v39 = vadd.f32 0.05243302, %v204_v27  ;;  %v241_v46 = vadd.f32 0.00028619796, %v240_v33  ;;  %v252_v48 = vadd.f32 0.001143296, %v251_v35  ;;  %593 = vmatpush.bf16.msra.mxu3 %v944_v3 }
  0x98   :  { %v162_v32 = vmul.f32 %v161_v28, %v1166_v10  ;;  %v173_v37 = vmul.f32 %v172_v31, %v1166_v10  ;;  %v217_v43 = vmul.f32 %v216_v36, %v1143_v41  ;;  %v126_v53 = vmul.f32 %v125_v38, %v1141_v40 }
  0x99   :  { %v138_v42 = vadd.f32 0.4994258, %v137_v34  ;;  %v206_v54 = vmul.f32 %v205_v39, %v1143_v41  ;;  %v253_v57 = vmul.f32 %v252_v48, %v1170_v17  ;;  %v242_v0 = vmul.f32 %v241_v46, %v1170_v17 }
  0x9a   :  { %v174_v44 = vadd.f32 0.014752088, %v173_v37  ;;  %v163_v45 = vadd.f32 0.0036580483, %v162_v32  ;;  %v218_v49 = vadd.f32 0.4994258, %v217_v43 }
  0x9b   :  { %v139_v47 = vmul.f32 %v138_v42, %v1141_v40  ;;  %v127_v5 = vadd.f32 0.18741608, %v126_v53  ;;  %v207_v6 = vadd.f32 0.18741608, %v206_v54  ;;  %v254_v7 = vadd.f32 0.014752088, %v253_v57 }
  0x9c   :  { %v175_v50 = vmul.f32 %v174_v44, %v1166_v10  ;;  %v219_v60 = vmul.f32 %v218_v49, %v1143_v41  ;;  %v164_v63 = vmul.f32 %v163_v45, %v1166_v10  ;;  %v243_v9 = vadd.f32 0.0036580483, %v242_v0 }
  0x9d   :  { %v140_v55 = vadd.f32 1.0, %v139_v47  ;;  %v255_v12 = vmul.f32 %v254_v7, %v1170_v17  ;;  %v128_v14 = vmul.f32 %v127_v5, %v1141_v40  ;;  %v208_v15 = vmul.f32 %v207_v6, %v1143_v41 }
  0x9e   :  { %v176_v62 = vadd.f32 0.112945676, %v175_v50  ;;  %v1191_v2 = vadd.f32 1.0, %v219_v60  ;;  %v165_v8 = vadd.f32 0.05243302, %v164_v63  ;;  %v244_v21 = vmul.f32 %v243_v9, %v1170_v17 }
  0x9f   :  { %975 = vrcp.f32 %v140_v55  ;;  %v256_v19 = vadd.f32 0.112945676, %v255_v12  ;;  %v152_v28 = vand.u32 2147483648, %v140_v55  ;;  %v129_v31 = vadd.f32 1.1283791, %v128_v14 }
  0xa0   :  { %v177_v4 = vmul.f32 %v176_v62, %v1166_v10  ;;  %977 = vrcp.f32 %v1191_v2  ;;  %v166_v20 = vmul.f32 %v165_v8, %v1166_v10  ;;  %v209_v32 = vadd.f32 1.1283791, %v208_v15 }
  0xa1   :  { %v257_v30 = vmul.f32 %v256_v19, %v1170_v17  ;;  %v150_v33 = vand.u32 2147483647, %v140_v55  ;;  %v245_v34 = vadd.f32 0.05243302, %v244_v21  ;;  %vm146_vm1 = vweird.f32 %v140_v55 }
  0xa2   :  { %v178_v11 = vadd.f32 0.4994258, %v177_v4  ;;  %v167_v37 = vadd.f32 0.18741608, %v166_v20  ;;  %v153_v39 = vor.u32 1.1754944e-38, %v152_v28  ;;  %v232_v42 = vand.u32 2147483648, %v1191_v2 }
  0xa3   :  { %v258_v36 = vadd.f32 0.4994258, %v257_v30  ;;  %v230_v44 = vand.u32 2147483647, %v1191_v2  ;;  %v130_v46 = vmul.f32 %v129_v31, %v1132_v25  ;;  %v210_v47 = vmul.f32 %v209_v32, %v1135_v26 }
  0xa4   :  { %v179_v18 = vmul.f32 %v178_v11, %v1166_v10  ;;  %vm151_vm4 = vcmp.eq.f32.partialorder %v150_v33, 8.507059e+37  ;;  %vm226_vm5 = vweird.f32 %v1191_v2  ;;  %v246_v56 = vmul.f32 %v245_v34, %v1170_v17 }
  0xa5   :  { %v976_v13 = vpop.eup %975  ;;  %v259_v45 = vmul.f32 %v258_v36, %v1170_v17  ;;  %v233_v60 = vor.u32 1.1754944e-38, %v232_v42  ;;  %vm231_vm7 = vcmp.eq.f32.partialorder %v230_v44, 8.507059e+37  ;;  %v110_v63 = vmul.f32 0.5, %v1127_v23 }
  0xa6   :  { %v142_v16 = vmul.f32 %v976_v13, %v140_v55  ;;  %v978_v22 = vpop.eup %977  ;;  %v1201_v29 = vadd.f32 1.0, %v179_v18  ;;  %vm147_vm0 = vweird.f32 %v976_v13  ;;  %v168_v55 = vmul.f32 %v167_v37, %v1166_v10 }
  0xa7   :  { %v222_v40 = vmul.f32 %v978_v22, %v1191_v2  ;;  %vm148_vm2 = vmor %vm146_vm1, %vm147_vm0  ;;  %vm227_vm3 = vweird.f32 %v978_v22  ;;  %v260_v53 = vadd.f32 1.0, %v259_v45  ;;  %v247_v3 = vadd.f32 0.18741608, %v246_v56  ;;  %v958_v56 = vld [vmem:[#allocation6 + $0x30] sm:$0xff] }
  0xa8   :  { %v143_v27 = vsub.f32 1.0, %v142_v16  ;;  %979 = vrcp.f32 %v1201_v29  ;;  %vm228_vm6 = vmor %vm226_vm5, %vm227_vm3  ;;  %v169_v2 = vadd.f32 1.1283791, %v168_v55  ;;  %v192_v4 = vand.u32 2147483648, %v1201_v29  ;;  %v973_v55 = vld [vmem:[%s1239_s4] ss:$0 sm:$0xff] }
  0xa9   :  { %v223_v35 = vsub.f32 1.0, %v222_v40  ;;  %981 = vrcp.f32 %v260_v53  ;;  %v190_v7 = vand.u32 2147483647, %v1201_v29  ;;  %v112_v11 = vmul.f32 0.5, %v1129_v24 }
  0xaa   :  { %v144_v41 = vmul.f32 %v976_v13, %v143_v27  ;;  %vm186_vm9 = vweird.f32 %v1201_v29  ;;  %v248_v23 = vmul.f32 %v247_v3, %v1170_v17  ;;  %v193_v15 = vor.u32 1.1754944e-38, %v192_v4  ;;  %v954_v4 = vld [vmem:[#allocation6 + $0x10] sm:$0xff] }
  0xab   :  { %v224_v43 = vmul.f32 %v978_v22, %v223_v35  ;;  %v170_v18 = vmul.f32 %v169_v2, %v1153_v58  ;;  %vm191_vm11 = vcmp.eq.f32.partialorder %v190_v7, 8.507059e+37  ;;  %v272_v28 = vand.u32 2147483648, %v260_v53 }
  0xac   :  { %v145_v38 = vadd.f32 %v976_v13, %v144_v41  ;;  %v249_v30 = vadd.f32 1.1283791, %v248_v23  ;;  %vm266_vm13 = vweird.f32 %v260_v53  ;;  %v111_v40 = vmul.f32 0.5, %v1147_v51 }
  0xad   :  { %v225_v50 = vadd.f32 %v978_v22, %v224_v43  ;;  %v273_v41 = vor.u32 1.1754944e-38, %v272_v28  ;;  %v113_v42 = vmul.f32 0.5, %v1149_v52 }
  0xae   :  { %v149_v48 = vsel %vm148_vm2, %v976_v13, %v145_v38  ;;  %v980_v54 = vpop.eup %979  ;;  %v250_v33 = vmul.f32 %v249_v30, %v1156_v59 }
  0xaf   :  { %v154_v49 = vsel %vm151_vm4, %v153_v39, %v149_v48  ;;  %v229_v61 = vsel %vm228_vm6, %v978_v22, %v225_v50  ;;  %v182_v25 = vmul.f32 %v980_v54, %v1201_v29  ;;  %vm187_vm8 = vweird.f32 %v980_v54  ;;  %v982_v9 = vpop.eup %981 }
  0xb0   :  { %v155_v57 = vmul.f32 %v154_v49, %v130_v46  ;;  %v234_v62 = vsel %vm231_vm7, %v233_v60, %v229_v61  ;;  %vm188_vm10 = vmor %vm186_vm9, %vm187_vm8  ;;  %v262_v16 = vmul.f32 %v982_v9, %v260_v53  ;;  %vm267_vm12 = vweird.f32 %v982_v9  ;;  %v957_v60 = vld [vmem:[#allocation6 + $0x28] sm:$0xff] }
  0xb1   :  { %v235_v0 = vmul.f32 %v234_v62, %v210_v47  ;;  %v183_v1 = vsub.f32 1.0, %v182_v25  ;;  %v270_v29 = vand.u32 2147483647, %v260_v53  ;;  %vm268_vm14 = vmor %vm266_vm13, %vm267_vm12  ;;  %v959_v53 = vld [vmem:[#allocation6 + $0x38] sm:$0xff] }
  0xb2   :  { %v755_v26 = vclamps-f32 %v155_v57, 1.0  ;;  %v263_v22 = vsub.f32 1.0, %v262_v16  ;;  %723 = vmatpush.bf16.msrb.mxu0 %v959_v53 }
  0xb3   :  { %v757_v5 = vclamps-f32 %v235_v0, 1.0  ;;  %v184_v6 = vmul.f32 %v980_v54, %v183_v1  ;;  %vm271_vm15 = vcmp.eq.f32.partialorder %v270_v29, 8.507059e+37  ;;  %v955_v1 = vld [vmem:[#allocation6 + $0x18] sm:$0xff] }
  0xb4   :  { %v278_v10 = vadd.f32 1.0, %v755_v26  ;;  %v264_v31 = vmul.f32 %v982_v9, %v263_v22  ;;  %v956_v26 = vld [vmem:[#allocation6 + $0x20] sm:$0xff] }
  0xb5   :  { %v280_v12 = vadd.f32 1.0, %v757_v5  ;;  %v185_v13 = vadd.f32 %v980_v54, %v184_v6 }
  0xb6   :  { %v282_v8 = vmul.f32 %v278_v10, %v110_v63  ;;  %v265_v32 = vadd.f32 %v982_v9, %v264_v31  ;;  %724 = vmatpush.bf16.msrb.mxu0 %v958_v56 }
  0xb7   :  { %v284_v19 = vmul.f32 %v280_v12, %v112_v11  ;;  %v189_v20 = vsel %vm188_vm10, %v980_v54, %v185_v13  ;;  %v952_v13 = vld [vmem:[#allocation6] sm:$0xff] }
  0xb8   :  { %v287_v14 = vpack.c.bf16 %v282_v8, %v282_v8  ;;  %v194_v21 = vsel %vm191_vm11, %v193_v15, %v189_v20  ;;  %v269_v34 = vsel %vm268_vm14, %v982_v9, %v265_v32  ;;  %v953_v8 = vld [vmem:[#allocation6 + $0x8] sm:$0xff] }
  0xb9   :  { %v289_v27 = vpack.c.bf16 %v284_v19, %v284_v19  ;;  %v195_v24 = vmul.f32 %v194_v21, %v170_v18  ;;  %v274_v36 = vsel %vm271_vm15, %v273_v41, %v269_v34 }
  0xba   :  { %555 = vmatmul.bf16.vlgmr.msra.gmra.mxu0 %v287_v14  ;;  %v275_v37 = vmul.f32 %v274_v36, %v250_v33 }
  0xbb   :  { %581 = vmatmul.bf16.vlgmr.msra.gmra.mxu2 %v289_v27  ;;  %v756_v17 = vclamps-f32 %v195_v24, 1.0  ;;  %725 = vmatpush.bf16.msrb.mxu0 %v957_v60 }
  0xbc   :  { %v758_v39 = vclamps-f32 %v275_v37, 1.0 }
  0xbd   :  { %v279_v58 = vadd.f32 1.0, %v756_v17 }
  0xbe   :  { %v281_v43 = vadd.f32 1.0, %v758_v39 }
  0xbf   :  { %v283_v35 = vmul.f32 %v279_v58, %v111_v40  ;;  %726 = vmatpush.bf16.msrb.mxu0 %v956_v26 }
  0xc0   :  { %v285_v44 = vmul.f32 %v281_v43, %v113_v42  ;;  %v974_v43 = vld [vmem:[%s1241_s6] ss:$0 sm:$0xff] }
  0xc1   :  { %v288_v38 = vpack.c.bf16 %v283_v35, %v283_v35 }
  0xc2   :  { %v290_v45 = vpack.c.bf16 %v285_v44, %v285_v44 }
  0xc3   :  { %568 = vmatmul.bf16.vlgmr.msra.gmra.mxu1 %v288_v38  ;;  %727 = vmatpush.bf16.msrb.mxu0 %v955_v1 }
  0xc4   :  { %594 = vmatmul.bf16.vlgmr.msra.gmra.mxu3 %v290_v45 }
  0xc7   :  { %728 = vmatpush.bf16.msrb.mxu0 %v954_v4 }
  0xcb   :  { %729 = vmatpush.bf16.msrb.mxu0 %v953_v8 }
  0xcf   :  { %730 = vmatpush.bf16.msrb.mxu0 %v952_v13 }
 0x137   :  { %v556_v51 = vpop.f32.mrf.mxu0 }
 0x13e   :  { %v582_v47 = vpop.f32.mrf.mxu2 }
 0x13f   :  { %v558_v46 = vpop.f32.mrf.mxu0 }
 0x140   :  { %v569_v48 = vpop.f32.mrf.mxu1 }
 0x141   :  { %v570_v59 = vadd.f32 %v569_v48, %v556_v51 }
 0x143   :  { %v583_v54 = vadd.f32 %v582_v47, %v570_v59 }
 0x146   :  { %v584_v49 = vpop.f32.mrf.mxu2 }
 0x147   :  { %v595_v52 = vpop.f32.mrf.mxu3 }
 0x148   :  { %v571_v50 = vpop.f32.mrf.mxu1  ;;  %v596_v57 = vadd.f32 %v595_v52, %v583_v54 }
 0x14a   :  { %v609_v61 = vadd.f32 %v973_v55, %v596_v57 }
 0x14c   :  { %v611_v25 = vmul.f32 0.70710677, %v609_v61  ;;  %v610_v37 = vmul.f32 0.5, %v609_v61 }
 0x14e   :  { %v612_v62 = vmul.f32 %v611_v25, %v611_v25 }
 0x14f   :  { %v597_v63 = vpop.f32.mrf.mxu3 }
 0x150   :  { %v613_v0 = vmin.f32 %v612_v62, 16.0 }
 0x152   :  { %v614_v2 = vmul.f32 2.1237322e-06, %v613_v0  ;;  %v625_v3 = vmul.f32 3.8918573e-05, %v613_v0 }
 0x154   :  { %v615_v10 = vadd.f32 0.00028619796, %v614_v2  ;;  %v626_v5 = vadd.f32 0.001143296, %v625_v3 }
 0x156   :  { %v616_v6 = vmul.f32 %v615_v10, %v613_v0  ;;  %v627_v7 = vmul.f32 %v626_v5, %v613_v0 }
 0x158   :  { %v628_v9 = vadd.f32 0.014752088, %v627_v7  ;;  %v617_v11 = vadd.f32 0.0036580483, %v616_v6 }
 0x15a   :  { %v629_v12 = vmul.f32 %v628_v9, %v613_v0  ;;  %v618_v14 = vmul.f32 %v617_v11, %v613_v0 }
 0x15c   :  { %v630_v23 = vadd.f32 0.112945676, %v629_v12  ;;  %v619_v18 = vadd.f32 0.05243302, %v618_v14 }
 0x15e   :  { %v631_v15 = vmul.f32 %v630_v23, %v613_v0  ;;  %v620_v21 = vmul.f32 %v619_v18, %v613_v0 }
 0x160   :  { %v632_v16 = vadd.f32 0.4994258, %v631_v15  ;;  %v621_v22 = vadd.f32 0.18741608, %v620_v21 }
 0x162   :  { %v633_v19 = vmul.f32 %v632_v16, %v613_v0  ;;  %v622_v24 = vmul.f32 %v621_v22, %v613_v0 }
 0x164   :  { %v634_v20 = vadd.f32 1.0, %v633_v19  ;;  %v623_v29 = vadd.f32 1.1283791, %v622_v24 }
 0x166   :  { %983 = vrcp.f32 %v634_v20  ;;  %v646_v31 = vand.u32 2147483648, %v634_v20  ;;  %v644_v32 = vand.u32 2147483647, %v634_v20  ;;  %vm640_vm1 = vweird.f32 %v634_v20 }
 0x167   :  { %v624_v41 = vmul.f32 %v623_v29, %v611_v25 }
 0x168   :  { %v647_v58 = vor.u32 1.1754944e-38, %v646_v31  ;;  %vm645_vm3 = vcmp.eq.f32.partialorder %v644_v32, 8.507059e+37 }
 0x16c   :  { %v984_v27 = vpop.eup %983 }
 0x16d   :  { %v636_v28 = vmul.f32 %v984_v27, %v634_v20  ;;  %vm641_vm0 = vweird.f32 %v984_v27 }
 0x16e   :  { %vm642_vm2 = vmor %vm640_vm1, %vm641_vm0 }
 0x16f   :  { %v637_v30 = vsub.f32 1.0, %v636_v28 }
 0x171   :  { %v638_v17 = vmul.f32 %v984_v27, %v637_v30 }
 0x173   :  { %v639_v40 = vadd.f32 %v984_v27, %v638_v17 }
 0x175   :  { %v643_v33 = vsel %vm642_vm2, %v984_v27, %v639_v40 }
 0x176   :  { %v648_v34 = vsel %vm645_vm3, %v647_v58, %v643_v33 }
 0x177   :  { %v649_v35 = vmul.f32 %v648_v34, %v624_v41 }
 0x179   :  { %v887_v36 = vclamps-f32 %v649_v35, 1.0 }
 0x17b   :  { %v652_v38 = vadd.f32 1.0, %v887_v36 }
 0x17d   :  { %v653_v39 = vmul.f32 %v652_v38, %v610_v37 }
 0x17f   :  { %v654_v42 = vpack.c.bf16 %v653_v39, %v653_v39 }
 0x181   :  { %731 = vmatmul.bf16.vlgmr.msrb.gmra.mxu0 %v654_v42 }
 0x1fe   :  { %v732_v44 = vpop.f32.mrf.mxu0 }
 0x1ff   :  { %v733_v45 = vadd.f32 %v974_v43, %v732_v44 }
 0x201   :  { %736 = vst [vmem:[#allocation8] sm:$0xff] %v733_v45 }
 0x202   :  { %747 = dma.vmem_to_hbm [thread:$0]  %s743_s18, 128, %s745_s21, [#allocation5]  }
 0x206   :  { %v734_v51 = vpop.f32.mrf.mxu0 }
 0x207   :  { %1061 = dma.done.wait [#allocation5], 128  }
 0x208   :  { %1062 = vsyncadd [#allocation5], 4294967168 }
 0x209   :  { %752 = vsyncpa [#allocation4], 1 }
 0x20a   :  { %753 = vsyncpa [#allocation7], 1 }
 0x20b   :  { %754 = vsyncpa [#allocation5], 1 }

</bundles_post_ra>
